<compile_context>
chip_gen: v5e
topology: v5e:2x2
jax: 0.10.0
libtpu: 0.0.40
codegen_flags: <defaults>
</compile_context>

<pallas_src>
import jax
import jax.numpy as jnp
from jax.experimental import pallas as pl
from jax.experimental.pallas import tpu as pltpu


def _round_up(n: int, m: int) -> int:
    return (n + m - 1) // m * m


def _linear_kernel(x_ref, wt_ref, b_ref, o_ref, acc_ref):
    # x_ref: (tb, tk)  wt_ref: (tk, tn)  b_ref: (1, tn)  o_ref: (tb, tn)
    k = pl.program_id(2)

    @pl.when(k == 0)
    def _():
        acc_ref[...] = jnp.zeros_like(acc_ref)

    acc_ref[...] += jnp.dot(x_ref[...], wt_ref[...],
                            preferred_element_type=jnp.float32)

    @pl.when(k == pl.num_programs(2) - 1)
    def _():
        o_ref[...] = (acc_ref[...] + b_ref[...]).astype(o_ref.dtype)


def prepare_linear_params(weight, bias, *, use_bf16: bool = False):
    """One-time parameter prep (do at init time, NOT per forward call):
    transpose W to (Din, Dout) and zero-pad Dout up to a lane-dense multiple
    of 128 (exact: padded columns are zero)."""
    dout, _ = weight.shape
    dout_p = _round_up(dout, 128)
    w_t = weight.T                                   # (Din, Dout)
    b = bias
    if dout_p != dout:
        w_t = jnp.pad(w_t, ((0, 0), (0, dout_p - dout)))
        b = jnp.pad(b, (0, dout_p - dout))
    if use_bf16:
        w_t = w_t.astype(jnp.bfloat16)
    return w_t, b.reshape(1, dout_p).astype(jnp.float32)


def linear_regression_forward(x, w_t, bias2d, out_features, *,
                              block_b: int = 512, block_n: int = 512,
                              block_k: int = 512, use_bf16: bool = False):
    """y = x @ W.T + b with pre-prepared (w_t, bias2d) from prepare_linear_params."""
    B, Din = x.shape
    din_w, dout_p = w_t.shape
    assert din_w == Din
    out_dtype = x.dtype

    if use_bf16:
        x_in = x.astype(jnp.bfloat16)
        sub = 16                     # bf16 sublane packing
        in_bytes = 2
    else:
        x_in = x
        sub = 8
        in_bytes = 4

    # --- Batch (M) tile: multiple of sublane pack, ragged last tile allowed.
    tb = min(block_b, _round_up(B, sub))
    if pl.cdiv(B, tb) < 2 and B > sub:
        # Split so the grid has >= 2 M steps (v7x megacore gets work).
        tb = _round_up(pl.cdiv(B, 2), sub)
    m_tiles = pl.cdiv(B, tb)

    # --- K tile: must be a multiple of 128 or the full Din, and must divide Din
    #     exactly (a ragged K tile would add garbage into the accumulator).
    if Din % 128 == 0:
        tk = min(Din, block_k)
        while Din % tk != 0:
            tk -= 128
    else:
        tk = Din
    k_tiles = Din // tk

    # --- N tile: dout_p is a multiple of 128; ragged N is safe (clipped writes).
    tn = min(dout_p, block_n)
    n_tiles = pl.cdiv(dout_p, tn)

    # --- VMEM budget from the actual tile footprint (double-buffered I/O + acc).
    out_bytes = jnp.dtype(out_dtype).itemsize
    footprint = (2 * tb * tk * in_bytes      # x tiles
                 + 2 * tk * tn * in_bytes    # W.T tiles
                 + 2 * tn * 4                # bias tiles
                 + 2 * tb * tn * out_bytes   # output tiles
                 + tb * tn * 4)              # f32 accumulator scratch
    vmem_limit = int(min(max(2 * footprint + (8 << 20), 16 << 20), 64 << 20))

    cost = pl.CostEstimate(
        flops=2 * B * Din * dout_p,
        bytes_accessed=in_bytes * (B * Din + Din * dout_p) + B * dout_p * out_bytes,
        transcendentals=0)

    y = pl.pallas_call(
        _linear_kernel,
        out_shape=jax.ShapeDtypeStruct((B, dout_p), out_dtype),
        grid_spec=pltpu.PrefetchScalarGridSpec(
            num_scalar_prefetch=0,
            grid=(m_tiles, n_tiles, k_tiles),
            in_specs=[
                pl.BlockSpec((tb, tk), lambda i, j, k: (i, k)),   # x
                pl.BlockSpec((tk, tn), lambda i, j, k: (k, j)),   # W.T
                pl.BlockSpec((1, tn), lambda i, j, k: (0, j)),    # bias
            ],
            out_specs=pl.BlockSpec((tb, tn), lambda i, j, k: (i, j)),
            scratch_shapes=[pltpu.VMEM((tb, tn), jnp.float32)],
        ),
        compiler_params=pltpu.CompilerParams(
            dimension_semantics=("parallel", "parallel", "arbitrary"),
            vmem_limit_bytes=vmem_limit,
        ),
        cost_estimate=cost,
    )(x_in, w_t, bias2d)

    # Strip lane padding only when it exists (no batch slice needed).
    if dout_p != out_features:
        y = y[:, :out_features]
    return y


if __name__ == "__main__":
    # Small shapes consistent with the module: input_dim=32, output_dim=16, batch=8
    batch, input_dim, output_dim = 8, 32, 16

    key = jax.random.PRNGKey(0)
    kx, kw, kb = jax.random.split(key, 3)

    x = jax.random.normal(kx, (batch, input_dim), dtype=jnp.float32)
    # Deterministic init mimicking nn.Linear's uniform(-1/sqrt(fan_in), 1/sqrt(fan_in))
    bound = 1.0 / jnp.sqrt(jnp.float32(input_dim))
    weight = jax.random.uniform(kw, (output_dim, input_dim), dtype=jnp.float32,
                                minval=-bound, maxval=bound)
    bias = jax.random.uniform(kb, (output_dim,), dtype=jnp.float32,
                              minval=-bound, maxval=bound)

    # One-time parameter prep (transpose + lane padding), then the forward pass.
    w_t, bias2d = prepare_linear_params(weight, bias, use_bf16=False)
    y = linear_regression_forward(x, w_t, bias2d, output_dim, use_bf16=False)
    y = jax.block_until_ready(y)

    # Correctness check against plain JAX reference (f32 path is exact).
    y_ref = x @ weight.T + bias
    assert y.shape == (batch, output_dim)
    assert jnp.allclose(y, y_ref, atol=1e-5, rtol=1e-5)

    print("KERNEL_OK")
</pallas_src>

<mosaic_0001>
module attributes {stable_mosaic.version = 11 : i64} {
  func.func @_linear_kernel(%arg0: i32, %arg1: i32, %arg2: i32, %arg3: memref<8x32xf32, #tpu.memory_space<vmem>>, %arg4: memref<32x128xf32, #tpu.memory_space<vmem>>, %arg5: memref<1x128xf32, #tpu.memory_space<vmem>>, %arg6: memref<8x128xf32, #tpu.memory_space<vmem>>, %arg7: memref<8x128xf32, #tpu.memory_space<vmem>>) attributes {dimension_semantics = [#tpu.dimension_semantics<parallel>, #tpu.dimension_semantics<parallel>, #tpu.dimension_semantics<arbitrary>], iteration_bounds = array<i64: 1, 1, 1>, scalar_prefetch = 0 : i64, scratch_operands = 1 : i64, tpu.core_type = #tpu.core_type<tc>, window_params = [{transform_indices = @transform_0, window_bounds = array<i64: 8, 32>}, {transform_indices = @transform_1, window_bounds = array<i64: 32, 128>}, {transform_indices = @transform_2, window_bounds = array<i64: 1, 128>}, {transform_indices = @transform_3, window_bounds = array<i64: 8, 128>}]} {
    %c0_i32 = arith.constant 0 : i32
    %0 = arith.cmpi eq, %arg2, %c0_i32 : i32
    %1 = arith.extui %0 : i1 to i32
    %c0_i32_0 = arith.constant 0 : i32
    %2 = arith.cmpi ne, %1, %c0_i32_0 : i32
    scf.if %2 {
      %cst_10 = arith.constant 0.000000e+00 : f32
      %12 = vector.broadcast %cst_10 : f32 to vector<8x128xf32>
      %c0_11 = arith.constant 0 : index
      %c0_12 = arith.constant 0 : index
      %13 = vector.load %arg7[%c0_11, %c0_12] : memref<8x128xf32, #tpu.memory_space<vmem>>, vector<8x128xf32>
      tpu.vector_store %arg7[%c0_11, %c0_12], %12 {strides = array<i32>} : memref<8x128xf32, #tpu.memory_space<vmem>>, vector<8x128xf32>,
    } else {
    }
    %c0 = arith.constant 0 : index
    %c0_1 = arith.constant 0 : index
    %3 = vector.load %arg7[%c0, %c0_1] : memref<8x128xf32, #tpu.memory_space<vmem>>, vector<8x128xf32>
    %c0_2 = arith.constant 0 : index
    %c0_3 = arith.constant 0 : index
    %4 = vector.load %arg3[%c0_2, %c0_3] : memref<8x32xf32, #tpu.memory_space<vmem>>, vector<8x32xf32>
    %c0_4 = arith.constant 0 : index
    %c0_5 = arith.constant 0 : index
    %5 = vector.load %arg4[%c0_4, %c0_5] : memref<32x128xf32, #tpu.memory_space<vmem>>, vector<32x128xf32>
    %cst = arith.constant dense<0.000000e+00> : vector<8x128xf32>
    %6 = tpu.matmul %4, %5, %cst {dimension_numbers = #tpu.dot_dimension_numbers<[1], [0], [0], [1], [0, 0, 1, 1], [], []>} : vector<8x32xf32>, vector<32x128xf32>, vector<8x128xf32> -> vector<8x128xf32>
    %7 = arith.addf %3, %6 : vector<8x128xf32>
    %c0_6 = arith.constant 0 : index
    %c0_7 = arith.constant 0 : index
    %8 = vector.load %arg7[%c0_6, %c0_7] : memref<8x128xf32, #tpu.memory_space<vmem>>, vector<8x128xf32>
    tpu.vector_store %arg7[%c0_6, %c0_7], %7 {strides = array<i32>} : memref<8x128xf32, #tpu.memory_space<vmem>>, vector<8x128xf32>,
    %c0_i32_8 = arith.constant 0 : i32
    %9 = arith.cmpi eq, %arg2, %c0_i32_8 : i32
    %10 = arith.extui %9 : i1 to i32
    %c0_i32_9 = arith.constant 0 : i32
    %11 = arith.cmpi ne, %10, %c0_i32_9 : i32
    scf.if %11 {
      %c0_10 = arith.constant 0 : index
      %c0_11 = arith.constant 0 : index
      %12 = vector.load %arg7[%c0_10, %c0_11] : memref<8x128xf32, #tpu.memory_space<vmem>>, vector<8x128xf32>
      %c0_12 = arith.constant 0 : index
      %c0_13 = arith.constant 0 : index
      %13 = vector.load %arg5[%c0_12, %c0_13] : memref<1x128xf32, #tpu.memory_space<vmem>>, vector<1x128xf32>
      %14 = vector.broadcast %13 : vector<1x128xf32> to vector<8x128xf32>
      %15 = arith.addf %12, %14 : vector<8x128xf32>
      %c0_14 = arith.constant 0 : index
      %c0_15 = arith.constant 0 : index
      %16 = vector.load %arg6[%c0_14, %c0_15] : memref<8x128xf32, #tpu.memory_space<vmem>>, vector<8x128xf32>
      tpu.vector_store %arg6[%c0_14, %c0_15], %15 {strides = array<i32>} : memref<8x128xf32, #tpu.memory_space<vmem>>, vector<8x128xf32>,
    } else {
    }
    return
  }
  func.func @transform_0(%arg0: i32, %arg1: i32, %arg2: i32) -> (i32, i32) {
    %c0_i32 = arith.constant 0 : i32
    return %arg0, %arg2 : i32, i32
  }
  func.func @transform_1(%arg0: i32, %arg1: i32, %arg2: i32) -> (i32, i32) {
    %c0_i32 = arith.constant 0 : i32
    return %arg2, %arg1 : i32, i32
  }
  func.func @transform_2(%arg0: i32, %arg1: i32, %arg2: i32) -> (i32, i32) {
    %c0_i32 = arith.constant 0 : i32
    %c0_i32_0 = arith.constant 0 : i32
    return %c0_i32, %arg1 : i32, i32
  }
  func.func @transform_3(%arg0: i32, %arg1: i32, %arg2: i32) -> (i32, i32) {
    %c0_i32 = arith.constant 0 : i32
    return %arg0, %arg1 : i32, i32
  }
}

</mosaic_0001>

<bundles_post_ra>
// kernel: tpu_custom_call.1
= control target key start
LH: loop header
LB: loop body
LE: loop exit
PB: predicated region body
PF: predicated region fallthrough
CT: control target
= control target key end

     0   :  { %8 = vsyncpa [#allocation4], 0  ;;  %s232_s0 = inlined_call_operand.hbm [shape: f32[8,32], index: 0, kind: input, shape index: {}]   ;;  %s233_s1 = inlined_call_operand.hbm [shape: f32[32,128], index: 1, kind: input, shape index: {}]   ;;  %s234_s2 = inlined_call_operand.vmem [shape: f32[1,128], index: 2, kind: input, shape index: {}]   ;;  %s235_s3 = inlined_call_operand.hbm [shape: f32[8,128], index: 3, kind: output, shape index: {}]  }
   0x1   :  { %9 = vsyncpa [#allocation7], 0 }
   0x2   :  { %10 = vsyncpa [#allocation5], 0  ;;  %s16_s14 = sshll.u32 %s232_s0, 4  ;;  %s195_s15 = smov [#allocation3]   ;;  %s17_s14 = int_to_ptr.hbm [resolvable:$true] %s16_s14 }
   0x3   :  { %s18_s16 = sshll.u32 %s195_s15, 4  ;;  %s26_s19 = sshll.u32 %s233_s1, 4  ;;  %s19_s16 = int_to_ptr.vmem [resolvable:$true] %s18_s16  ;;  %s27_s19 = int_to_ptr.hbm [resolvable:$true] %s26_s19 }
   0x4   :  { %21 = dma.hbm_to_vmem [thread:$0]  %s17_s14, 128, %s19_s16, [#allocation4]  }
   0x5   :  { %s196_s20 = smov [#allocation6]   ;;  %s197_s22 = smov 128  }
   0x6   :  { %s28_s21 = sshll.u32 %s196_s20, 4  ;;  %s198_s23 = smov 8   ;;  %s29_s21 = int_to_ptr.vmem [resolvable:$true] %s28_s21 }
   0x7   :  { %34 = dma.hbm_to_vmem [thread:$0]  %s27_s19, 512, %s29_s21, [#allocation7], %s197_s22, %s197_s22, %s198_s23  }
   0x8   :  { %189 = dma.done.wait [#allocation4], 128  }
   0x9   :  { %190 = vsyncadd [#allocation4], 4294967168 }
   0xa   :  { %191 = dma.done.wait [#allocation7], 512  }
   0xb   :  { %192 = vsyncadd [#allocation7], 4294966784  ;;  %v55_v0 = vld [vmem:[#allocation6 + $0x18] sm:$0xff]  ;;  %v54_v1 = vld [vmem:[#allocation6 + $0x10] sm:$0xff]  ;;  %vm56_vm0 = vcmask 261120   ;;  %s199_s24 = smov [#allocation8]  }
   0xc   :  { %72 = vmatpush.msra.mxu0 %v55_v0  ;;  %v53_v2 = vld [vmem:[#allocation6 + $0x8] sm:$0xff]  ;;  %v52_v3 = vld [vmem:[#allocation6] sm:$0xff]  ;;  %v51_v4 = vld [vmem:[#allocation3] sm:$0xff]  ;;  %s97_s25 = sshll.u32 %s199_s24, 4  ;;  %s99_s28 = sshll.u32 %s235_s3, 4  ;;  %s98_s25 = int_to_ptr.vmem [resolvable:$true] %s97_s25  ;;  %s100_s28 = int_to_ptr.hbm [resolvable:$true] %s99_s28 }
   0xd   :  { %v116_v5 = vld [vmem:[%s234_s2] ss:$0 sm:$0xff] }
   0xe   :  { %73 = vmatpush.msra.mxu0 %v54_v1 }
  0x10   :  { %74 = vmatpush.msra.mxu0 %v53_v2 }
  0x12   :  { %75 = vmatpush.msra.mxu0 %v52_v3 }
  0x13   :  { %110 = vmatmul.msk.f32.vlgmr.msra.gmra.mxu0 %vm56_vm0, %v51_v4 }
  0x90   :  { %v77_v6 = vpop.f32.mrf.mxu0 }
  0x91   :  { %v90_v7 = vadd.f32 %v116_v5, %v77_v6 }
  0x93   :  { %91 = vst [vmem:[#allocation8] sm:$0xff] %v90_v7 }
  0x94   :  { %102 = dma.vmem_to_hbm [thread:$0]  %s98_s25, 128, %s100_s28, [#allocation5]  }
  0x95   :  { %193 = dma.done.wait [#allocation5], 128  }
  0x96   :  { %194 = vsyncadd [#allocation5], 4294967168 }
  0x97   :  { %107 = vsyncpa [#allocation4], 1 }
  0x98   :  { %108 = vsyncpa [#allocation7], 1 }
  0x99   :  { %109 = vsyncpa [#allocation5], 1 }

</bundles_post_ra>
